<compile_context>
chip_gen: v7x
topology: tpu7x:2x2x1
jax: 0.10.0
libtpu: 0.0.40
codegen_flags: <defaults>
</compile_context>

<pallas_src>
import jax
import jax.numpy as jnp
from jax.experimental import pallas as pl
from jax.experimental.pallas import tpu as pltpu


# --------------------------------------------------------------------------- #
# Helpers
# --------------------------------------------------------------------------- #

_FUSED_TABLE_BYTES_LIMIT = 4 * 1024 * 1024   # both extended tables together
_FUSED_VOCAB_LIMIT = 2048                    # bounds one-hot VALU cost
_VMEM_LIMIT_BYTES = 32 * 1024 * 1024         # safe on v5e/v6e/v7x


def _round_up(x, m):
    return ((x + m - 1) // m) * m


def _cdiv(a, b):
    return (a + b - 1) // b


def _pad1d(x, n):
    pad = n - x.shape[0]
    if pad == 0:
        return x
    return jnp.concatenate([x, jnp.zeros((pad,), x.dtype)])


def _choose_tile_fused(batch, vocab, d_ext):
    """Batch tile (lane axis) for the fused path.

    Per-step vector working set ~= TB * 4B * (2*V one-hots + 2*D_ext gathered
    tiles + a few 8-sublane-padded (2, TB)/(1, TB) rows).  Kept <= ~8 MiB so
    resident tables + double-buffered streams + intermediates stay well inside
    v7x's 32 MiB scoped VMEM default."""
    per_row = 4 * (2 * vocab + 2 * d_ext + 64)
    budget = 8 * 1024 * 1024
    cap = max(128, min(4096, (budget // per_row) // 128 * 128))
    return min(cap, _round_up(batch, 128))


def _choose_tile_fallback(batch, dim):
    """Batch tile (sublane axis) for the HBM-streaming fallback path.

    Two (TB, D) f32 embedding streams x 2 pipeline buffers, plus the (TB, 4)
    scalars stream which is lane-padded to TB x 128 f32 x 2 buffers (1 KiB/row).
    ~16 MiB budget amortizes the ~0.35 us per-grid-step overhead."""
    per_row = 2 * 2 * dim * 4 + 1024
    budget = 16 * 1024 * 1024
    cap = max(128, min(4096, (budget // per_row) // 128 * 128))
    return min(cap, _round_up(batch, 8))


# --------------------------------------------------------------------------- #
# Fused-gather kernel (VMEM-resident extended tables, batch on lanes)
# --------------------------------------------------------------------------- #

def _glove_fused_kernel(ids_ref, sc_ref, ev_ref, eu_ref, out_ref, acc_ref):
    """One batch tile, batch axis on lanes.

    ids_ref: (2, TB) int32   row 0 = center ids, row 1 = target ids
    sc_ref : (2, TB) f32     row 0 = cooc,       row 1 = weight
    ev_ref : (D_ext, V) f32  extended center table (transposed, VMEM-resident)
    eu_ref : (D_ext, V) f32  extended target table (transposed, VMEM-resident)
    out_ref: (1, 1)  f32     per-core loss (written on the last step)
    acc_ref: (1, TB) f32     lane-dense running partials
    """
    @pl.when(pl.program_id(1) == 0)
    def _init():
        acc_ref[...] = jnp.zeros_like(acc_ref)

    ids = ids_ref[...]                                   # (2, TB)
    vocab = ev_ref.shape[1]
    tb = ids.shape[1]

    # One-hot selectors, (V, TB): column b selects table row ids[., b].
    row_id = jax.lax.broadcasted_iota(jnp.int32, (vocab, tb), 0)
    onehot_c = (row_id == ids[0:1, :]).astype(jnp.float32)
    onehot_t = (row_id == ids[1:2, :]).astype(jnp.float32)

    # In-kernel gather on the MXU: (D_ext, V) @ (V, TB) -> (D_ext, TB).
    ce = jnp.dot(ev_ref[...], onehot_c, preferred_element_type=jnp.float32)
    te = jnp.dot(eu_ref[...], onehot_t, preferred_element_type=jnp.float32)

    # Extended rows are [emb, bias, 1] / [emb, 1, bias], so the column-wise dot
    # already equals inner + center_bias + target_bias.  Sublane reduce only:
    # the batch axis stays on lanes, so no lane-direction XLU reduce is needed.
    s = jnp.sum(ce * te, axis=0, keepdims=True)          # (1, TB)

    sc = sc_ref[...]
    diff = s - sc[0:1, :]                                # cooc row
    acc_ref[...] = acc_ref[...] + sc[1:2, :] * diff * diff   # weight row

    @pl.when(pl.program_id(1) == pl.num_programs(1) - 1)
    def _finalize():
        out_ref[...] = jnp.sum(acc_ref[...], keepdims=True)


def _glove_forward_fused(params, c_ids, t_ids, coocs, weights):
    vocab, dim = params["embedding_v"].shape
    d_ext = _round_up(dim + 2, 128)
    batch = c_ids.shape[0]

    # Extended tables (built once, XLA side):
    #   ev row i = [emb_v[i], v_bias[i], 1, 0...]
    #   eu row j = [emb_u[j], 1, u_bias[j], 0...]
    # so <ev[c], eu[t]> = inner + center_bias + target_bias.
    ones = jnp.ones((vocab, 1), jnp.float32)
    zpad = jnp.zeros((vocab, d_ext - dim - 2), jnp.float32)
    ev = jnp.concatenate(
        [params["embedding_v"].astype(jnp.float32),
         params["v_bias"].astype(jnp.float32).reshape(vocab, 1), ones, zpad],
        axis=1)
    eu = jnp.concatenate(
        [params["embedding_u"].astype(jnp.float32),
         ones, params["u_bias"].astype(jnp.float32).reshape(vocab, 1), zpad],
        axis=1)
    ev_t = ev.T                                          # (D_ext, V)
    eu_t = eu.T

    tile_b = _choose_tile_fused(batch, vocab, d_ext)
    num_tiles = _cdiv(batch, tile_b)
    ncores = 2 if num_tiles >= 2 else 1                  # v7x: 2 TensorCores
    num_tiles = _round_up(num_tiles, ncores)
    tiles_per_core = num_tiles // ncores
    b_pad = num_tiles * tile_b

    # Padded rows: id 0 (gathers a real, finite row) and weight 0 -> zero loss.
    ids = jnp.stack(
        [_pad1d(c_ids.astype(jnp.int32), b_pad),
         _pad1d(t_ids.astype(jnp.int32), b_pad)], axis=0)                 # (2, B_pad)
    sc = jnp.stack(
        [_pad1d(coocs.reshape(batch).astype(jnp.float32), b_pad),
         _pad1d(weights.reshape(batch).astype(jnp.float32), b_pad)], axis=0)

    tile_map = lambda c, i: (0, c * tiles_per_core + i)
    table_map = lambda c, i: (0, 0)                      # resident across grid

    out = pl.pallas_call(
        _glove_fused_kernel,
        out_shape=jax.ShapeDtypeStruct((ncores, 1), jnp.float32),
        grid=(ncores, tiles_per_core),
        in_specs=[
            pl.BlockSpec((2, tile_b), tile_map),         # ids (lane-dense)
            pl.BlockSpec((2, tile_b), tile_map),         # cooc / weight (lane-dense)
            pl.BlockSpec((d_ext, vocab), table_map),     # extended table v
            pl.BlockSpec((d_ext, vocab), table_map),     # extended table u
        ],
        out_specs=pl.BlockSpec((1, 1), lambda c, i: (c, 0)),
        scratch_shapes=[pltpu.VMEM((1, tile_b), jnp.float32)],
        compiler_params=pltpu.CompilerParams(
            dimension_semantics=("parallel", "arbitrary"),
            vmem_limit_bytes=_VMEM_LIMIT_BYTES,
        ),
    )(ids, sc, ev_t, eu_t)
    return jnp.sum(out)


# --------------------------------------------------------------------------- #
# Fallback kernel for large tables (HBM-streaming, gathered rows on sublanes)
# --------------------------------------------------------------------------- #

def _glove_fallback_kernel(ce_ref, te_ref, sc_ref, out_ref):
    """One batch tile of pre-gathered rows (batch axis on sublanes).

    ce_ref/te_ref: (TB, D) f32 gathered embedding rows
    sc_ref       : (TB, 4) f32 [center_bias, target_bias, cooc, weight]
    out_ref      : (1, 1)  f32 per-core loss (VMEM-resident accumulator
                   across the "arbitrary" grid axis)
    """
    @pl.when(pl.program_id(1) == 0)
    def _init():
        out_ref[...] = jnp.zeros_like(out_ref)

    inner = jnp.sum(ce_ref[...] * te_ref[...], axis=-1, keepdims=True)   # (TB, 1)
    sc = sc_ref[...]
    diff = inner + sc[:, 0:1] + sc[:, 1:2] - sc[:, 2:3]
    # This path streams 2 x (TB, D) f32 per step from HBM, so it is HBM-bound;
    # the lane reduce and the scalar accumulate are hidden behind the DMA.
    out_ref[...] = out_ref[...] + jnp.sum(sc[:, 3:4] * diff * diff)


def _glove_forward_fallback(params, c_ids, t_ids, coocs, weights):
    vocab, dim = params["embedding_v"].shape
    batch = c_ids.shape[0]

    tile_b = _choose_tile_fallback(batch, dim)
    num_tiles = _cdiv(batch, tile_b)
    ncores = 2 if num_tiles >= 2 else 1
    num_tiles = _round_up(num_tiles, ncores)
    tiles_per_core = num_tiles // ncores
    b_pad = num_tiles * tile_b

    c_p = _pad1d(c_ids.astype(jnp.int32), b_pad)
    t_p = _pad1d(t_ids.astype(jnp.int32), b_pad)
    co_p = _pad1d(coocs.reshape(batch).astype(jnp.float32), b_pad)
    w_p = _pad1d(weights.reshape(batch).astype(jnp.float32), b_pad)  # 0 weight -> 0 loss

    # TODO(synk): replace these XLA gathers with an in-kernel double-buffered
    # pltpu.make_async_copy row gather (memory_space=pl.ANY tables +
    # scalar-prefetched ids) to cut HBM traffic on embedding rows to ~1x.
    ce = jnp.take(params["embedding_v"].astype(jnp.float32), c_p, axis=0)   # (B_pad, D)
    te = jnp.take(params["embedding_u"].astype(jnp.float32), t_p, axis=0)   # (B_pad, D)
    cb = jnp.take(params["v_bias"].astype(jnp.float32), c_p, axis=0).reshape(b_pad, 1)
    ub = jnp.take(params["u_bias"].astype(jnp.float32), t_p, axis=0).reshape(b_pad, 1)
    sc = jnp.concatenate(
        [cb, ub, co_p.reshape(b_pad, 1), w_p.reshape(b_pad, 1)], axis=1)    # (B_pad, 4)

    tile_map = lambda c, i: (c * tiles_per_core + i, 0)
    out = pl.pallas_call(
        _glove_fallback_kernel,
        out_shape=jax.ShapeDtypeStruct((ncores, 1), jnp.float32),
        grid=(ncores, tiles_per_core),
        in_specs=[
            pl.BlockSpec((tile_b, dim), tile_map),
            pl.BlockSpec((tile_b, dim), tile_map),
            pl.BlockSpec((tile_b, 4), tile_map),
        ],
        out_specs=pl.BlockSpec((1, 1), lambda c, i: (c, 0)),
        compiler_params=pltpu.CompilerParams(
            dimension_semantics=("parallel", "arbitrary"),
            vmem_limit_bytes=_VMEM_LIMIT_BYTES,
        ),
    )(ce, te, sc)
    return jnp.sum(out)


# --------------------------------------------------------------------------- #
# Public forward + init + reference
# --------------------------------------------------------------------------- #

def glove_forward(params, center_words, target_words, coocs, weights):
    """Equivalent of Glove.forward. center/target_words: (B, 1) or (B,) int32."""
    vocab, dim = params["embedding_v"].shape
    batch = center_words.shape[0]
    c_ids = center_words.reshape(batch)
    t_ids = target_words.reshape(batch)

    d_ext = _round_up(dim + 2, 128)
    table_bytes = 2 * vocab * d_ext * 4
    if vocab <= _FUSED_VOCAB_LIMIT and table_bytes <= _FUSED_TABLE_BYTES_LIMIT:
        # Tables fit comfortably in VMEM on all generations (incl. v7x's 64 MiB
        # physical / 32 MiB scoped) -> fused in-kernel gather path.
        return _glove_forward_fused(params, c_ids, t_ids, coocs, weights)
    return _glove_forward_fallback(params, c_ids, t_ids, coocs, weights)


def init_glove_params(key, vocab_size, projection_dim):
    """Deterministic init matching the PyTorch module's uniform init."""
    initrange = (2.0 / (vocab_size + projection_dim)) ** 0.5
    k1, k2, k3, k4 = jax.random.split(key, 4)
    u = lambda k, shape: jax.random.uniform(
        k, shape, dtype=jnp.float32, minval=-initrange, maxval=initrange)
    return {
        "embedding_v": u(k1, (vocab_size, projection_dim)),
        "embedding_u": u(k2, (vocab_size, projection_dim)),
        "v_bias": u(k3, (vocab_size, 1)),
        "u_bias": u(k4, (vocab_size, 1)),
    }


def glove_forward_ref(params, center_words, target_words, coocs, weights):
    """Pure-JAX reference mirroring the PyTorch forward."""
    batch = center_words.shape[0]
    c_ids = center_words.reshape(batch)
    t_ids = target_words.reshape(batch)
    ce = jnp.take(params["embedding_v"], c_ids, axis=0)
    te = jnp.take(params["embedding_u"], t_ids, axis=0)
    cb = jnp.take(params["v_bias"], c_ids, axis=0)[:, 0]
    tb = jnp.take(params["u_bias"], t_ids, axis=0)[:, 0]
    inner = jnp.sum(ce * te, axis=-1)
    diff = inner + cb + tb - coocs.reshape(batch)
    return jnp.sum(weights.reshape(batch) * diff * diff)


# --------------------------------------------------------------------------- #
# Self-test
# --------------------------------------------------------------------------- #

if __name__ == "__main__":
    # Tolerances are sized so the asserts hold even if the MXU lowers the f32
    # gather matmul with reduced-precision (bf16) passes; with full-f32 passes
    # the observed error is ~1e-6 relative.

    # --- small case (module's toy shapes) -> fused VMEM-resident-table path ---
    vocab_size, projection_dim, batch = 64, 128, 8
    key = jax.random.PRNGKey(0)
    kp, kc, kt, kco, kw = jax.random.split(key, 5)
    params = init_glove_params(kp, vocab_size, projection_dim)
    center_words = jax.random.randint(kc, (batch, 1), 0, vocab_size, dtype=jnp.int32)
    target_words = jax.random.randint(kt, (batch, 1), 0, vocab_size, dtype=jnp.int32)
    coocs = jax.random.uniform(kco, (batch, 1), dtype=jnp.float32, maxval=5.0)
    weights = jax.random.uniform(kw, (batch, 1), dtype=jnp.float32)

    loss = glove_forward(params, center_words, target_words, coocs, weights)
    jax.block_until_ready(loss)
    ref = glove_forward_ref(params, center_words, target_words, coocs, weights)
    jax.block_until_ready(ref)
    assert jnp.allclose(loss, ref, rtol=2e-3, atol=1e-3), (loss, ref)

    # --- larger fused case: multi-tile grid + 2-core parallel axis + padding ---
    vocab2, dim2, batch2 = 128, 64, 20000
    key2 = jax.random.PRNGKey(1)
    kp2, kc2, kt2, kco2, kw2 = jax.random.split(key2, 5)
    params2 = init_glove_params(kp2, vocab2, dim2)
    cw2 = jax.random.randint(kc2, (batch2, 1), 0, vocab2, dtype=jnp.int32)
    tw2 = jax.random.randint(kt2, (batch2, 1), 0, vocab2, dtype=jnp.int32)
    co2 = jax.random.uniform(kco2, (batch2, 1), dtype=jnp.float32, maxval=5.0)
    w2 = jax.random.uniform(kw2, (batch2, 1), dtype=jnp.float32)

    loss2 = glove_forward(params2, cw2, tw2, co2, w2)
    jax.block_until_ready(loss2)
    ref2 = glove_forward_ref(params2, cw2, tw2, co2, w2)
    jax.block_until_ready(ref2)
    assert jnp.allclose(loss2, ref2, rtol=2e-3, atol=1e-1), (loss2, ref2)

    # --- large-table case -> HBM-streaming fallback path (tiled, 2-D grid) ----
    vocab3, dim3, batch3 = 4096, 256, 8000
    key3 = jax.random.PRNGKey(2)
    kp3, kc3, kt3, kco3, kw3 = jax.random.split(key3, 5)
    params3 = init_glove_params(kp3, vocab3, dim3)
    cw3 = jax.random.randint(kc3, (batch3, 1), 0, vocab3, dtype=jnp.int32)
    tw3 = jax.random.randint(kt3, (batch3, 1), 0, vocab3, dtype=jnp.int32)
    co3 = jax.random.uniform(kco3, (batch3, 1), dtype=jnp.float32, maxval=5.0)
    w3 = jax.random.uniform(kw3, (batch3, 1), dtype=jnp.float32)

    loss3 = glove_forward(params3, cw3, tw3, co3, w3)
    jax.block_until_ready(loss3)
    ref3 = glove_forward_ref(params3, cw3, tw3, co3, w3)
    jax.block_until_ready(ref3)
    assert jnp.allclose(loss3, ref3, rtol=2e-3, atol=1e-1), (loss3, ref3)

    print("KERNEL_OK")
</pallas_src>

<mosaic_0001>
module attributes {stable_mosaic.version = 11 : i64} {
  func.func @_glove_fused_kernel(%arg0: i32, %arg1: i32, %arg2: memref<2x128xi32, #tpu.memory_space<vmem>>, %arg3: memref<2x128xf32, #tpu.memory_space<vmem>>, %arg4: memref<256x64xf32, #tpu.memory_space<vmem>>, %arg5: memref<256x64xf32, #tpu.memory_space<vmem>>, %arg6: memref<1x1xf32, #tpu.memory_space<vmem>>, %arg7: memref<1x128xf32, #tpu.memory_space<vmem>>) attributes {dimension_semantics = [#tpu.dimension_semantics<parallel>, #tpu.dimension_semantics<arbitrary>], iteration_bounds = array<i64: 1, 1>, scalar_prefetch = 0 : i64, scratch_operands = 1 : i64, tpu.core_type = #tpu.core_type<tc>, window_params = [{transform_indices = @transform_0, window_bounds = array<i64: 2, 128>}, {transform_indices = @transform_1, window_bounds = array<i64: 2, 128>}, {pipeline_mode = #tpu.pipeline_mode<synchronous>, transform_indices = @transform_2, window_bounds = array<i64: 256, 64>}, {pipeline_mode = #tpu.pipeline_mode<synchronous>, transform_indices = @transform_3, window_bounds = array<i64: 256, 64>}, {transform_indices = @transform_4, window_bounds = array<i64: 1, 1>}]} {
    %c0_i32 = arith.constant 0 : i32
    %0 = arith.cmpi eq, %arg1, %c0_i32 : i32
    %1 = arith.extui %0 : i1 to i32
    %c0_i32_0 = arith.constant 0 : i32
    %2 = arith.cmpi ne, %1, %c0_i32_0 : i32
    scf.if %2 {
      %cst_16 = arith.constant 0.000000e+00 : f32
      %34 = vector.broadcast %cst_16 : f32 to vector<1x128xf32>
      %c0_17 = arith.constant 0 : index
      %c0_18 = arith.constant 0 : index
      %35 = vector.load %arg7[%c0_17, %c0_18] : memref<1x128xf32, #tpu.memory_space<vmem>>, vector<1x128xf32>
      tpu.vector_store %arg7[%c0_17, %c0_18], %34 {strides = array<i32>} : memref<1x128xf32, #tpu.memory_space<vmem>>, vector<1x128xf32>,
    } else {
    }
    %c0 = arith.constant 0 : index
    %c0_1 = arith.constant 0 : index
    %3 = vector.load %arg2[%c0, %c0_1] : memref<2x128xi32, #tpu.memory_space<vmem>>, vector<2x128xi32>
    %4 = tpu.iota {dimensions = array<i32: 0>} : vector<64x128xi32>
    %5 = vector.extract_strided_slice %3 {offsets = [0, 0], sizes = [1, 128], strides = [1, 1]} : vector<2x128xi32> to vector<1x128xi32>
    %6 = vector.broadcast %5 : vector<1x128xi32> to vector<64x128xi32>
    %7 = arith.cmpi eq, %4, %6 : vector<64x128xi32>
    %8 = arith.extui %7 : vector<64x128xi1> to vector<64x128xi32>
    %9 = arith.sitofp %8 : vector<64x128xi32> to vector<64x128xf32>
    %10 = vector.extract_strided_slice %3 {offsets = [1, 0], sizes = [1, 128], strides = [1, 1]} : vector<2x128xi32> to vector<1x128xi32>
    %11 = vector.broadcast %10 : vector<1x128xi32> to vector<64x128xi32>
    %12 = arith.cmpi eq, %4, %11 : vector<64x128xi32>
    %13 = arith.extui %12 : vector<64x128xi1> to vector<64x128xi32>
    %14 = arith.sitofp %13 : vector<64x128xi32> to vector<64x128xf32>
    %c0_2 = arith.constant 0 : index
    %c0_3 = arith.constant 0 : index
    %15 = vector.load %arg4[%c0_2, %c0_3] : memref<256x64xf32, #tpu.memory_space<vmem>>, vector<256x64xf32>
    %cst = arith.constant dense<0.000000e+00> : vector<256x128xf32>
    %16 = tpu.matmul %15, %9, %cst {dimension_numbers = #tpu.dot_dimension_numbers<[1], [0], [0], [1], [0, 0, 1, 1], [], []>} : vector<256x64xf32>, vector<64x128xf32>, vector<256x128xf32> -> vector<256x128xf32>
    %c0_4 = arith.constant 0 : index
    %c0_5 = arith.constant 0 : index
    %17 = vector.load %arg5[%c0_4, %c0_5] : memref<256x64xf32, #tpu.memory_space<vmem>>, vector<256x64xf32>
    %cst_6 = arith.constant dense<0.000000e+00> : vector<256x128xf32>
    %18 = tpu.matmul %17, %14, %cst_6 {dimension_numbers = #tpu.dot_dimension_numbers<[1], [0], [0], [1], [0, 0, 1, 1], [], []>} : vector<256x64xf32>, vector<64x128xf32>, vector<256x128xf32> -> vector<256x128xf32>
    %19 = arith.mulf %16, %18 : vector<256x128xf32>
    %cst_7 = arith.constant dense<0.000000e+00> : vector<128xf32>
    %20 = vector.multi_reduction <add>, %19, %cst_7 [0] : vector<256x128xf32> to vector<128xf32>
    %21 = vector.shape_cast %20 : vector<128xf32> to vector<1x128xf32>
    %c0_8 = arith.constant 0 : index
    %c0_9 = arith.constant 0 : index
    %22 = vector.load %arg3[%c0_8, %c0_9] : memref<2x128xf32, #tpu.memory_space<vmem>>, vector<2x128xf32>
    %23 = vector.extract_strided_slice %22 {offsets = [0, 0], sizes = [1, 128], strides = [1, 1]} : vector<2x128xf32> to vector<1x128xf32>
    %24 = arith.subf %21, %23 : vector<1x128xf32>
    %c0_10 = arith.constant 0 : index
    %c0_11 = arith.constant 0 : index
    %25 = vector.load %arg7[%c0_10, %c0_11] : memref<1x128xf32, #tpu.memory_space<vmem>>, vector<1x128xf32>
    %26 = vector.extract_strided_slice %22 {offsets = [1, 0], sizes = [1, 128], strides = [1, 1]} : vector<2x128xf32> to vector<1x128xf32>
    %27 = arith.mulf %26, %24 : vector<1x128xf32>
    %28 = arith.mulf %27, %24 : vector<1x128xf32>
    %29 = arith.addf %25, %28 : vector<1x128xf32>
    %c0_12 = arith.constant 0 : index
    %c0_13 = arith.constant 0 : index
    %30 = vector.load %arg7[%c0_12, %c0_13] : memref<1x128xf32, #tpu.memory_space<vmem>>, vector<1x128xf32>
    tpu.vector_store %arg7[%c0_12, %c0_13], %29 {strides = array<i32>} : memref<1x128xf32, #tpu.memory_space<vmem>>, vector<1x128xf32>,
    %c0_i32_14 = arith.constant 0 : i32
    %31 = arith.cmpi eq, %arg1, %c0_i32_14 : i32
    %32 = arith.extui %31 : i1 to i32
    %c0_i32_15 = arith.constant 0 : i32
    %33 = arith.cmpi ne, %32, %c0_i32_15 : i32
    scf.if %33 {
      %c0_16 = arith.constant 0 : index
      %c0_17 = arith.constant 0 : index
      %34 = vector.load %arg7[%c0_16, %c0_17] : memref<1x128xf32, #tpu.memory_space<vmem>>, vector<1x128xf32>
      %35 = vector.shape_cast %34 : vector<1x128xf32> to vector<1x1x128xf32>
      %cst_18 = arith.constant dense<0.000000e+00> : vector<1xf32>
      %36 = vector.multi_reduction <add>, %35, %cst_18 [1, 2] : vector<1x1x128xf32> to vector<1xf32>
      %37 = vector.shape_cast %36 : vector<1xf32> to vector<1x1x1xf32>
      %38 = vector.extract %37[0, 0, 0] : f32 from vector<1x1x1xf32>
      %39 = vector.broadcast %38 : f32 to vector<1x1xf32>
      %c0_19 = arith.constant 0 : index
      %c0_20 = arith.constant 0 : index
      %40 = vector.load %arg6[%c0_19, %c0_20] : memref<1x1xf32, #tpu.memory_space<vmem>>, vector<1x1xf32>
      tpu.vector_store %arg6[%c0_19, %c0_20], %39 {strides = array<i32>} : memref<1x1xf32, #tpu.memory_space<vmem>>, vector<1x1xf32>,
    } else {
    }
    return
  }
  func.func @transform_0(%arg0: i32, %arg1: i32) -> (i32, i32) {
    %c1_i32 = arith.constant 1 : i32
    %0 = arith.muli %arg0, %c1_i32 : i32
    %1 = arith.addi %0, %arg1 : i32
    %c0_i32 = arith.constant 0 : i32
    %c0_i32_0 = arith.constant 0 : i32
    return %c0_i32, %1 : i32, i32
  }
  func.func @transform_1(%arg0: i32, %arg1: i32) -> (i32, i32) {
    %c1_i32 = arith.constant 1 : i32
    %0 = arith.muli %arg0, %c1_i32 : i32
    %1 = arith.addi %0, %arg1 : i32
    %c0_i32 = arith.constant 0 : i32
    %c0_i32_0 = arith.constant 0 : i32
    return %c0_i32, %1 : i32, i32
  }
  func.func @transform_2(%arg0: i32, %arg1: i32) -> (i32, i32) {
    %c0_i32 = arith.constant 0 : i32
    %c0_i32_0 = arith.constant 0 : i32
    %c0_i32_1 = arith.constant 0 : i32
    return %c0_i32, %c0_i32_0 : i32, i32
  }
  func.func @transform_3(%arg0: i32, %arg1: i32) -> (i32, i32) {
    %c0_i32 = arith.constant 0 : i32
    %c0_i32_0 = arith.constant 0 : i32
    %c0_i32_1 = arith.constant 0 : i32
    return %c0_i32, %c0_i32_0 : i32, i32
  }
  func.func @transform_4(%arg0: i32, %arg1: i32) -> (i32, i32) {
    %c0_i32 = arith.constant 0 : i32
    %c0_i32_0 = arith.constant 0 : i32
    return %arg0, %c0_i32 : i32, i32
  }
}

</mosaic_0001>

<bundles_post_ra>
// kernel: tpu_custom_call.1
= control target key start
LH: loop header
LB: loop body
LE: loop exit
PB: predicated region body
PF: predicated region fallthrough
CT: control target
= control target key end

     0   :  { %v58_v0 = vlaneseq  ;;  %vm1660_vm0 = vcmask 523264   ;;  %v1336_v14 = vmov 1.0|1.0   ;;  %s1655_s0 = inlined_call_operand.vmem [shape: s32[2,128], index: 0, kind: input, shape index: {}]   ;;  %s1656_s1 = inlined_call_operand.vmem [shape: f32[2,128], index: 1, kind: input, shape index: {}]   ;;  %s1657_s2 = inlined_call_operand.vmem [shape: f32[256,64], index: 2, kind: input, shape index: {}]   ;;  %s1658_s3 = inlined_call_operand.vmem [shape: f32[256,64], index: 3, kind: input, shape index: {}]   ;;  %s1659_s4 = inlined_call_operand.hbm [shape: f32[1,1], index: 4, kind: output, shape index: {}]  }
   0x1   :  { %v123_v1 = vld [vmem:[%s1657_s2] sm:$0xff]  ;;  %v124_v17 = vld [vmem:[%s1657_s2 + $0x8] sm:$0xff]  ;;  %v125_v19 = vld [vmem:[%s1657_s2 + $0x10] sm:$0xff] }
   0x2   :  { %1162 = vmatprep.mubr.msk.f32.mxu0 %vm1660_vm0, %v123_v1  ;;  %v477_v2 = vld [vmem:[%s1658_s3] sm:$0xff]  ;;  %v1372_v3 = vshrl.u32 %v58_v0, 7  ;;  %v478_v18 = vld [vmem:[%s1658_s3 + $0x8] sm:$0xff]  ;;  %v479_v20 = vld [vmem:[%s1658_s3 + $0x10] sm:$0xff] }
   0x3   :  { %1226 = vmatprep.mubr.msk.f32.mxu1 %vm1660_vm0, %v477_v2  ;;  %v57_v4 = vld [vmem:[%s1655_s0] sm:$0x3] }
   0x4   :  { %v60_v5 = vadd.s32 8, %v1372_v3  ;;  %v69_v6 = vsub.s32 0, %v1372_v3  ;;  %v97_v7 = vsub.s32 1, %v1372_v3  ;;  %v61_v8 = vadd.s32 16, %v1372_v3 }
   0x5   :  { %v62_v9 = vadd.s32 24, %v1372_v3  ;;  %v63_v12 = vadd.s32 32, %v1372_v3  ;;  %v64_v13 = vadd.s32 40, %v1372_v3  ;;  %v65_v15 = vadd.s32 48, %v1372_v3 }
   0x6   :  { %v70_v10 = vrot.slane %v57_v4, %v69_v6  ;;  %v98_v11 = vrot.slane %v57_v4, %v97_v7  ;;  %v66_v16 = vadd.s32 56, %v1372_v3 }
   0x8   :  { %vm71_vm1 = vcmp.eq.s32.totalorder %v1372_v3, %v70_v10  ;;  %vm72_vm2 = vcmp.eq.s32.totalorder %v60_v5, %v70_v10  ;;  %vm99_vm3 = vcmp.eq.s32.totalorder %v1372_v3, %v98_v11  ;;  %vm100_vm4 = vcmp.eq.s32.totalorder %v60_v5, %v98_v11 }
   0x9   :  { %vm1274_vm5 = vmpackc.low %vm72_vm2, %vm71_vm1  ;;  %vm73_vm6 = vcmp.eq.s32.totalorder %v61_v8, %v70_v10  ;;  %vm74_vm7 = vcmp.eq.s32.totalorder %v62_v9, %v70_v10  ;;  %vm101_vm8 = vcmp.eq.s32.totalorder %v61_v8, %v98_v11  ;;  %vm102_vm9 = vcmp.eq.s32.totalorder %v62_v9, %v98_v11 }
   0xa   :  { %1275 = vmatprep.subr.msk.bf16.mxu0 %vm1274_vm5, %v1336_v14  ;;  %vm1290_vm10 = vmpackc.low %vm100_vm4, %vm99_vm3  ;;  %vm75_vm11 = vcmp.eq.s32.totalorder %v63_v12, %v70_v10  ;;  %vm76_vm12 = vcmp.eq.s32.totalorder %v64_v13, %v70_v10  ;;  %vm103_vm14 = vcmp.eq.s32.totalorder %v63_v12, %v98_v11  ;;  %vm104_vm15 = vcmp.eq.s32.totalorder %v64_v13, %v98_v11 }
   0xb   :  { %1291 = vmatprep.subr.msk.bf16.mxu1 %vm1290_vm10, %v1336_v14  ;;  %1277 = vmatpush3.bf16.msk.msra.mxu0 %vm1274_vm5, %v1336_v14  ;;  %vm1278_vm13 = vmpackc.low %vm74_vm7, %vm73_vm6  ;;  %vm77_vm3 = vcmp.eq.s32.totalorder %v65_v15, %v70_v10  ;;  %vm78_vm4 = vcmp.eq.s32.totalorder %v66_v16, %v70_v10  ;;  %vm105_vm5 = vcmp.eq.s32.totalorder %v65_v15, %v98_v11 }
   0xc   :  { %1293 = vmatpush3.bf16.msk.msra.mxu1 %vm1290_vm10, %v1336_v14  ;;  %1279 = vmatprep.subr.msk.bf16.mxu0 %vm1278_vm13, %v1336_v14  ;;  %vm1294_vm1 = vmpackc.low %vm102_vm9, %vm101_vm8  ;;  %vm106_vm6 = vcmp.eq.s32.totalorder %v66_v16, %v98_v11 }
   0xd   :  { %1295 = vmatprep.subr.msk.bf16.mxu1 %vm1294_vm1, %v1336_v14  ;;  %vm1282_vm2 = vmpackc.low %vm76_vm12, %vm75_vm11 }
   0xe   :  { %vm1298_vm0 = vmpackc.low %vm104_vm15, %vm103_vm14 }
   0xf   :  { %1281 = vmatpush3.bf16.msk.msra.mxu0 %vm1278_vm13, %v1336_v14  ;;  %vm1286_vm7 = vmpackc.low %vm78_vm4, %vm77_vm3 }
  0x10   :  { %1297 = vmatpush3.bf16.msk.msra.mxu1 %vm1294_vm1, %v1336_v14  ;;  %1283 = vmatprep.subr.msk.bf16.mxu0 %vm1282_vm2, %v1336_v14  ;;  %vm1302_vm10 = vmpackc.low %vm106_vm6, %vm105_vm5 }
  0x11   :  { %1299 = vmatprep.subr.msk.bf16.mxu1 %vm1298_vm0, %v1336_v14 }
  0x13   :  { %1285 = vmatpush3.bf16.msk.msra.mxu0 %vm1282_vm2, %v1336_v14 }
  0x14   :  { %1301 = vmatpush3.bf16.msk.msra.mxu1 %vm1298_vm0, %v1336_v14  ;;  %1287 = vmatprep.subr.msk.bf16.mxu0 %vm1286_vm7, %v1336_v14 }
  0x15   :  { %1303 = vmatprep.subr.msk.bf16.mxu1 %vm1302_vm10, %v1336_v14 }
  0x17   :  { %1289 = vmatpush3.bf16.msk.msra.mxu0 %vm1286_vm7, %v1336_v14 }
  0x18   :  { %1305 = vmatpush3.bf16.msk.msra.mxu1 %vm1302_vm10, %v1336_v14 }
  0x19   :  { %9 = vsyncpa [#allocation4], 0  ;;  %vm1661_vm0 = vcmask 523264   ;;  %v126_v21 = vld [vmem:[%s1657_s2 + $0x18] sm:$0xff]  ;;  %v127_v23 = vld [vmem:[%s1657_s2 + $0x20] sm:$0xff]  ;;  %v1337_v16 = vmov 0.0  }
  0x1a   :  { %1163 = vmatmul.mubr.msk.f32.vlgmr.msra.gmra.mrb[0].mxu0 %vm1661_vm0, %v124_v17  ;;  %vm1662_vm8 = vmmov %vm1661_vm0  ;;  %v480_v22 = vld [vmem:[%s1658_s3 + $0x18] sm:$0xff]  ;;  %v481_v24 = vld [vmem:[%s1658_s3 + $0x20] sm:$0xff]  ;;  %56 = vst [vmem:[#allocation2] sm:$0x1] %v1337_v16 }
  0x1b   :  { %1227 = vmatmul.mubr.msk.f32.vlgmr.msra.gmra.mrb[0].mxu1 %vm1662_vm8, %v478_v18  ;;  %vm1663_vm9 = vmmov %vm1661_vm0  ;;  %v128_v25 = vld [vmem:[%s1657_s2 + $0x28] sm:$0xff]  ;;  %v129_v27 = vld [vmem:[%s1657_s2 + $0x30] sm:$0xff] }
  0x1c   :  { %1165 = vmatprep.mubr.msk.f32.mxu0 %vm1663_vm9, %v125_v19  ;;  %vm1664_vm11 = vmmov %vm1661_vm0  ;;  %v482_v26 = vld [vmem:[%s1658_s3 + $0x28] sm:$0xff]  ;;  %v483_v28 = vld [vmem:[%s1658_s3 + $0x30] sm:$0xff] }
  0x1d   :  { %1229 = vmatprep.mubr.msk.f32.mxu1 %vm1664_vm11, %v479_v20  ;;  %vm1665_vm12 = vmmov %vm1661_vm0  ;;  %v130_v29 = vld [vmem:[%s1657_s2 + $0x38] sm:$0xff]  ;;  %v131_v31 = vld [vmem:[%s1657_s2 + $0x40] sm:$0xff] }
  0x1e   :  { %1166 = vmatmul.mubr.msk.f32.gmra.mrb[2].mxu0 %vm1665_vm12, %v126_v21  ;;  %vm1666_vm13 = vmmov %vm1661_vm0  ;;  %v484_v30 = vld [vmem:[%s1658_s3 + $0x38] sm:$0xff]  ;;  %v485_v32 = vld [vmem:[%s1658_s3 + $0x40] sm:$0xff] }
  0x1f   :  { %1230 = vmatmul.mubr.msk.f32.gmra.mrb[2].mxu1 %vm1666_vm13, %v480_v22  ;;  %vm1667_vm14 = vmmov %vm1661_vm0  ;;  %v132_v33 = vld [vmem:[%s1657_s2 + $0x48] sm:$0xff]  ;;  %v133_v35 = vld [vmem:[%s1657_s2 + $0x50] sm:$0xff] }
  0x20   :  { %1168 = vmatprep.mubr.msk.f32.mxu0 %vm1667_vm14, %v127_v23  ;;  %vm1668_vm15 = vmmov %vm1661_vm0  ;;  %v486_v34 = vld [vmem:[%s1658_s3 + $0x48] sm:$0xff]  ;;  %v487_v36 = vld [vmem:[%s1658_s3 + $0x50] sm:$0xff] }
  0x21   :  { %1232 = vmatprep.mubr.msk.f32.mxu1 %vm1668_vm15, %v481_v24  ;;  %vm1669_vm1 = vmmov %vm1661_vm0  ;;  %v134_v37 = vld [vmem:[%s1657_s2 + $0x58] sm:$0xff]  ;;  %v135_v39 = vld [vmem:[%s1657_s2 + $0x60] sm:$0xff] }
  0x22   :  { %1169 = vmatmul.mubr.msk.f32.gmra.mrb[4].mxu0 %vm1669_vm1, %v128_v25  ;;  %vm1670_vm2 = vmmov %vm1661_vm0  ;;  %v488_v38 = vld [vmem:[%s1658_s3 + $0x58] sm:$0xff]  ;;  %v489_v40 = vld [vmem:[%s1658_s3 + $0x60] sm:$0xff] }
  0x23   :  { %1233 = vmatmul.mubr.msk.f32.gmra.mrb[4].mxu1 %vm1670_vm2, %v482_v26  ;;  %vm1671_vm3 = vmmov %vm1661_vm0  ;;  %v136_v41 = vld [vmem:[%s1657_s2 + $0x68] sm:$0xff]  ;;  %v137_v43 = vld [vmem:[%s1657_s2 + $0x70] sm:$0xff] }
  0x24   :  { %1171 = vmatprep.mubr.msk.f32.mxu0 %vm1671_vm3, %v129_v27  ;;  %vm1672_vm4 = vmmov %vm1661_vm0  ;;  %v490_v42 = vld [vmem:[%s1658_s3 + $0x68] sm:$0xff]  ;;  %v491_v44 = vld [vmem:[%s1658_s3 + $0x70] sm:$0xff] }
  0x25   :  { %1235 = vmatprep.mubr.msk.f32.mxu1 %vm1672_vm4, %v483_v28  ;;  %vm1673_vm5 = vmmov %vm1661_vm0  ;;  %v138_v45 = vld [vmem:[%s1657_s2 + $0x78] sm:$0xff]  ;;  %v139_v47 = vld [vmem:[%s1657_s2 + $0x80] sm:$0xff] }
  0x26   :  { %1172 = vmatmul.mubr.msk.f32.gmra.mrb[6].mxu0 %vm1673_vm5, %v130_v29  ;;  %vm1674_vm6 = vmmov %vm1661_vm0  ;;  %v492_v46 = vld [vmem:[%s1658_s3 + $0x78] sm:$0xff]  ;;  %v493_v48 = vld [vmem:[%s1658_s3 + $0x80] sm:$0xff] }
  0x27   :  { %1236 = vmatmul.mubr.msk.f32.gmra.mrb[6].mxu1 %vm1674_vm6, %v484_v30  ;;  %vm1675_vm7 = vmmov %vm1661_vm0  ;;  %v140_v49 = vld [vmem:[%s1657_s2 + $0x88] sm:$0xff]  ;;  %v141_v51 = vld [vmem:[%s1657_s2 + $0x90] sm:$0xff] }
  0x28   :  { %1174 = vmatprep.mubr.msk.f32.mxu0 %vm1675_vm7, %v131_v31  ;;  %vm1676_vm10 = vmmov %vm1661_vm0  ;;  %v494_v50 = vld [vmem:[%s1658_s3 + $0x88] sm:$0xff]  ;;  %v495_v52 = vld [vmem:[%s1658_s3 + $0x90] sm:$0xff] }
  0x29   :  { %1238 = vmatprep.mubr.msk.f32.mxu1 %vm1676_vm10, %v485_v32  ;;  %vm1677_vm8 = vmmov %vm1661_vm0  ;;  %v142_v53 = vld [vmem:[%s1657_s2 + $0x98] sm:$0xff]  ;;  %v143_v55 = vld [vmem:[%s1657_s2 + $0xa0] sm:$0xff] }
  0x2a   :  { %1175 = vmatmul.mubr.msk.f32.gmra.mrb[8].mxu0 %vm1661_vm0, %v132_v33  ;;  %vm1678_vm9 = vmmov %vm1661_vm0  ;;  %v496_v54 = vld [vmem:[%s1658_s3 + $0x98] sm:$0xff]  ;;  %v497_v56 = vld [vmem:[%s1658_s3 + $0xa0] sm:$0xff] }
  0x2b   :  { %1239 = vmatmul.mubr.msk.f32.gmra.mrb[8].mxu1 %vm1677_vm8, %v486_v34  ;;  %1177 = vmatprep.mubr.msk.f32.mxu0 %vm1678_vm9, %v133_v35  ;;  %vm1679_vm11 = vmmov %vm1661_vm0  ;;  %v144_v57 = vld [vmem:[%s1657_s2 + $0xa8] sm:$0xff]  ;;  %v145_v59 = vld [vmem:[%s1657_s2 + $0xb0] sm:$0xff] }
  0x2c   :  { %1241 = vmatprep.mubr.msk.f32.mxu1 %vm1679_vm11, %v487_v36  ;;  %vm1680_vm12 = vmmov %vm1661_vm0  ;;  %v498_v58 = vld [vmem:[%s1658_s3 + $0xa8] sm:$0xff]  ;;  %v499_v60 = vld [vmem:[%s1658_s3 + $0xb0] sm:$0xff] }
  0x2d   :  { %vm1681_vm13 = vmmov %vm1661_vm0  ;;  %v146_v61 = vld [vmem:[%s1657_s2 + $0xb8] sm:$0xff]  ;;  %v147_v63 = vld [vmem:[%s1657_s2 + $0xc0] sm:$0xff] }
  0x2e   :  { %1178 = vmatmul.mubr.msk.f32.gmra.mrb[10].mxu0 %vm1680_vm12, %v134_v37  ;;  %vm1682_vm14 = vmmov %vm1661_vm0  ;;  %v500_v62 = vld [vmem:[%s1658_s3 + $0xb8] sm:$0xff]  ;;  %v501_v0 = vld [vmem:[%s1658_s3 + $0xc0] sm:$0xff] }
  0x2f   :  { %1242 = vmatmul.mubr.msk.f32.gmra.mrb[10].mxu1 %vm1681_vm13, %v488_v38  ;;  %1180 = vmatprep.mubr.msk.f32.mxu0 %vm1682_vm14, %v135_v39  ;;  %vm1683_vm15 = vmmov %vm1661_vm0  ;;  %v148_v1 = vld [vmem:[%s1657_s2 + $0xc8] sm:$0xff]  ;;  %v149_v4 = vld [vmem:[%s1657_s2 + $0xd0] sm:$0xff] }
  0x30   :  { %1244 = vmatprep.mubr.msk.f32.mxu1 %vm1683_vm15, %v489_v40  ;;  %vm1684_vm1 = vmmov %vm1661_vm0  ;;  %v502_v2 = vld [vmem:[%s1658_s3 + $0xc8] sm:$0xff]  ;;  %v503_v5 = vld [vmem:[%s1658_s3 + $0xd0] sm:$0xff] }
  0x31   :  { %vm1685_vm2 = vmmov %vm1661_vm0  ;;  %v150_v6 = vld [vmem:[%s1657_s2 + $0xd8] sm:$0xff]  ;;  %v151_v8 = vld [vmem:[%s1657_s2 + $0xe0] sm:$0xff] }
  0x32   :  { %1181 = vmatmul.mubr.msk.f32.gmra.mrb[12].mxu0 %vm1684_vm1, %v136_v41  ;;  %vm1686_vm3 = vmmov %vm1661_vm0  ;;  %v504_v7 = vld [vmem:[%s1658_s3 + $0xd8] sm:$0xff]  ;;  %v505_v9 = vld [vmem:[%s1658_s3 + $0xe0] sm:$0xff] }
  0x33   :  { %1245 = vmatmul.mubr.msk.f32.gmra.mrb[12].mxu1 %vm1685_vm2, %v490_v42  ;;  %1183 = vmatprep.mubr.msk.f32.mxu0 %vm1686_vm3, %v137_v43  ;;  %vm1687_vm4 = vmmov %vm1661_vm0  ;;  %v152_v10 = vld [vmem:[%s1657_s2 + $0xe8] sm:$0xff]  ;;  %v153_v12 = vld [vmem:[%s1657_s2 + $0xf0] sm:$0xff] }
  0x34   :  { %1247 = vmatprep.mubr.msk.f32.mxu1 %vm1687_vm4, %v491_v44  ;;  %vm1688_vm5 = vmmov %vm1661_vm0  ;;  %v506_v11 = vld [vmem:[%s1658_s3 + $0xe8] sm:$0xff]  ;;  %v507_v13 = vld [vmem:[%s1658_s3 + $0xf0] sm:$0xff] }
  0x35   :  { %vm1689_vm6 = vmmov %vm1661_vm0  ;;  %v154_v14 = vld [vmem:[%s1657_s2 + $0xf8] sm:$0xff] }
  0x36   :  { %1184 = vmatmul.mubr.msk.f32.gmra.mrb[14].mxu0 %vm1688_vm5, %v138_v45  ;;  %vm1690_vm7 = vmmov %vm1661_vm0  ;;  %v508_v15 = vld [vmem:[%s1658_s3 + $0xf8] sm:$0xff] }
  0x37   :  { %1248 = vmatmul.mubr.msk.f32.gmra.mrb[14].mxu1 %vm1689_vm6, %v492_v46  ;;  %1186 = vmatprep.mubr.msk.f32.mxu0 %vm1690_vm7, %v139_v47  ;;  %vm1691_vm10 = vmmov %vm1661_vm0 }
  0x38   :  { %1250 = vmatprep.mubr.msk.f32.mxu1 %vm1691_vm10, %v493_v48  ;;  %vm1692_vm8 = vmmov %vm1661_vm0 }
  0x39   :  { %vm1693_vm9 = vmmov %vm1661_vm0 }
  0x3a   :  { %1187 = vmatmul.mubr.msk.f32.gmra.mrb[16].mxu0 %vm1661_vm0, %v140_v49  ;;  %vm1694_vm11 = vmmov %vm1661_vm0 }
  0x3b   :  { %1251 = vmatmul.mubr.msk.f32.gmra.mrb[16].mxu1 %vm1692_vm8, %v494_v50  ;;  %1189 = vmatprep.mubr.msk.f32.mxu0 %vm1693_vm9, %v141_v51  ;;  %vm1695_vm12 = vmmov %vm1661_vm0 }
  0x3c   :  { %1253 = vmatprep.mubr.msk.f32.mxu1 %vm1694_vm11, %v495_v52  ;;  %vm1696_vm13 = vmmov %vm1661_vm0 }
  0x3d   :  { %vm1697_vm14 = vmmov %vm1661_vm0 }
  0x3e   :  { %1190 = vmatmul.mubr.msk.f32.gmra.mrb[18].mxu0 %vm1695_vm12, %v142_v53  ;;  %vm1698_vm15 = vmmov %vm1661_vm0 }
  0x3f   :  { %1254 = vmatmul.mubr.msk.f32.gmra.mrb[18].mxu1 %vm1696_vm13, %v496_v54  ;;  %1192 = vmatprep.mubr.msk.f32.mxu0 %vm1697_vm14, %v143_v55  ;;  %vm1699_vm1 = vmmov %vm1661_vm0 }
  0x40   :  { %1256 = vmatprep.mubr.msk.f32.mxu1 %vm1698_vm15, %v497_v56  ;;  %vm1700_vm2 = vmmov %vm1661_vm0 }
  0x41   :  { %vm1701_vm3 = vmmov %vm1661_vm0 }
  0x42   :  { %1193 = vmatmul.mubr.msk.f32.gmra.mrb[20].mxu0 %vm1699_vm1, %v144_v57  ;;  %vm1702_vm4 = vmmov %vm1661_vm0 }
  0x43   :  { %1257 = vmatmul.mubr.msk.f32.gmra.mrb[20].mxu1 %vm1700_vm2, %v498_v58  ;;  %1195 = vmatprep.mubr.msk.f32.mxu0 %vm1701_vm3, %v145_v59  ;;  %vm1703_vm5 = vmmov %vm1661_vm0 }
  0x44   :  { %1259 = vmatprep.mubr.msk.f32.mxu1 %vm1702_vm4, %v499_v60  ;;  %vm1704_vm6 = vmmov %vm1661_vm0 }
  0x45   :  { %vm1705_vm7 = vmmov %vm1661_vm0 }
  0x46   :  { %1196 = vmatmul.mubr.msk.f32.gmra.mrb[22].mxu0 %vm1703_vm5, %v146_v61  ;;  %vm1706_vm10 = vmmov %vm1661_vm0 }
  0x47   :  { %1260 = vmatmul.mubr.msk.f32.gmra.mrb[22].mxu1 %vm1704_vm6, %v500_v62  ;;  %1198 = vmatprep.mubr.msk.f32.mxu0 %vm1705_vm7, %v147_v63  ;;  %vm1707_vm8 = vmmov %vm1661_vm0  ;;  %vm930_vm7 = vcmask 1040384  }
  0x48   :  { %1262 = vmatprep.mubr.msk.f32.mxu1 %vm1706_vm10, %v501_v0  ;;  %vm1708_vm9 = vmmov %vm1661_vm0  ;;  %vm942_vm10 = vcmask 0  }
  0x49   :  { %vm1709_vm11 = vmmov %vm1661_vm0 }
  0x4a   :  { %1199 = vmatmul.mubr.msk.f32.gmra.mrb[24].mxu0 %vm1661_vm0, %v148_v1  ;;  %vm1710_vm12 = vmmov %vm1661_vm0 }
  0x4b   :  { %1263 = vmatmul.mubr.msk.f32.gmra.mrb[24].mxu1 %vm1707_vm8, %v502_v2  ;;  %1201 = vmatprep.mubr.msk.f32.mxu0 %vm1708_vm9, %v149_v4  ;;  %vm1711_vm13 = vmmov %vm1661_vm0 }
  0x4c   :  { %1265 = vmatprep.mubr.msk.f32.mxu1 %vm1709_vm11, %v503_v5  ;;  %vm1712_vm14 = vmmov %vm1661_vm0 }
  0x4d   :  { %vm1713_vm15 = vmmov %vm1661_vm0 }
  0x4e   :  { %1202 = vmatmul.mubr.msk.f32.gmra.mrb[26].mxu0 %vm1710_vm12, %v150_v6  ;;  %vm1714_vm1 = vmmov %vm1661_vm0 }
  0x4f   :  { %1266 = vmatmul.mubr.msk.f32.gmra.mrb[26].mxu1 %vm1711_vm13, %v504_v7  ;;  %1204 = vmatprep.mubr.msk.f32.mxu0 %vm1712_vm14, %v151_v8  ;;  %vm1715_vm2 = vmmov %vm1661_vm0 }
  0x50   :  { %1268 = vmatprep.mubr.msk.f32.mxu1 %vm1713_vm15, %v505_v9  ;;  %vm1716_vm3 = vmmov %vm1661_vm0 }
  0x51   :  { %vm1717_vm4 = vmmov %vm1661_vm0 }
  0x52   :  { %1205 = vmatmul.mubr.msk.f32.gmra.mrb[28].mxu0 %vm1714_vm1, %v152_v10  ;;  %vm1718_vm5 = vmmov %vm1661_vm0 }
  0x53   :  { %1269 = vmatmul.mubr.msk.f32.gmra.mrb[28].mxu1 %vm1715_vm2, %v506_v11  ;;  %1207 = vmatprep.mubr.msk.f32.mxu0 %vm1716_vm3, %v153_v12  ;;  %vm1719_vm6 = vmmov %vm1661_vm0 }
  0x54   :  { %1271 = vmatprep.mubr.msk.f32.mxu1 %vm1717_vm4, %v507_v13 }
  0x56   :  { %1208 = vmatmul.mubr.msk.f32.gmra.mrb[30].mxu0 %vm1718_vm5, %v154_v14 }
  0x57   :  { %1272 = vmatmul.mubr.msk.f32.gmra.mrb[30].mxu1 %vm1719_vm6, %v508_v15 }
  0xed   :  { %v1164_v17 = vpop.f32.mrb[0].mxu0 }
  0xee   :  { %v1228_v18 = vpop.f32.mrb[0].mxu1  ;;  %v318_v19 = vpop.f32.mrb[1].mxu0 }
  0xef   :  { %v831_v20 = vmul.f32 %v1228_v18, %v1164_v17  ;;  %v671_v21 = vpop.f32.mrb[1].mxu1 }
  0xf0   :  { %v830_v22 = vmul.f32 %v671_v21, %v318_v19 }
  0xf1   :  { %v1167_v23 = vpop.f32.mrb[2].mxu0 }
  0xf2   :  { %v862_v24 = vadd.f32 %v831_v20, %v830_v22  ;;  %v1231_v25 = vpop.f32.mrb[2].mxu1  ;;  %v328_v26 = vpop.f32.mrb[3].mxu0 }
  0xf3   :  { %v833_v27 = vmul.f32 %v1231_v25, %v1167_v23  ;;  %v681_v28 = vpop.f32.mrb[3].mxu1 }
  0xf4   :  { %v832_v29 = vmul.f32 %v681_v28, %v328_v26 }
  0xf5   :  { %v1170_v30 = vpop.f32.mrb[4].mxu0 }
  0xf6   :  { %v863_v31 = vadd.f32 %v862_v24, %v832_v29  ;;  %v1234_v32 = vpop.f32.mrb[4].mxu1  ;;  %v338_v33 = vpop.f32.mrb[5].mxu0 }
  0xf7   :  { %v835_v34 = vmul.f32 %v1234_v32, %v1170_v30  ;;  %v691_v35 = vpop.f32.mrb[5].mxu1 }
  0xf8   :  { %v834_v36 = vmul.f32 %v691_v35, %v338_v33  ;;  %v864_v37 = vadd.f32 %v863_v31, %v833_v27 }
  0xf9   :  { %v1173_v38 = vpop.f32.mrb[6].mxu0 }
  0xfa   :  { %v865_v39 = vadd.f32 %v864_v37, %v834_v36  ;;  %v1237_v40 = vpop.f32.mrb[6].mxu1  ;;  %v348_v41 = vpop.f32.mrb[7].mxu0 }
  0xfb   :  { %v837_v42 = vmul.f32 %v1237_v40, %v1173_v38  ;;  %v701_v43 = vpop.f32.mrb[7].mxu1 }
  0xfc   :  { %v836_v44 = vmul.f32 %v701_v43, %v348_v41  ;;  %v866_v45 = vadd.f32 %v865_v39, %v835_v34 }
  0xfd   :  { %v1176_v46 = vpop.f32.mrb[8].mxu0 }
  0xfe   :  { %v867_v47 = vadd.f32 %v866_v45, %v836_v44  ;;  %v1240_v48 = vpop.f32.mrb[8].mxu1  ;;  %v358_v49 = vpop.f32.mrb[9].mxu0 }
  0xff   :  { %v839_v50 = vmul.f32 %v1240_v48, %v1176_v46  ;;  %v711_v51 = vpop.f32.mrb[9].mxu1 }
 0x100   :  { %v838_v52 = vmul.f32 %v711_v51, %v358_v49  ;;  %v868_v53 = vadd.f32 %v867_v47, %v837_v42 }
 0x101   :  { %v1179_v54 = vpop.f32.mrb[10].mxu0 }
 0x102   :  { %v869_v55 = vadd.f32 %v868_v53, %v838_v52  ;;  %v1243_v56 = vpop.f32.mrb[10].mxu1  ;;  %v368_v57 = vpop.f32.mrb[11].mxu0 }
 0x103   :  { %v841_v58 = vmul.f32 %v1243_v56, %v1179_v54  ;;  %v721_v59 = vpop.f32.mrb[11].mxu1 }
 0x104   :  { %v840_v60 = vmul.f32 %v721_v59, %v368_v57  ;;  %v870_v61 = vadd.f32 %v869_v55, %v839_v50 }
 0x105   :  { %v1182_v62 = vpop.f32.mrb[12].mxu0 }
 0x106   :  { %v871_v63 = vadd.f32 %v870_v61, %v840_v60  ;;  %v1246_v0 = vpop.f32.mrb[12].mxu1  ;;  %v378_v1 = vpop.f32.mrb[13].mxu0 }
 0x107   :  { %v843_v2 = vmul.f32 %v1246_v0, %v1182_v62  ;;  %v731_v4 = vpop.f32.mrb[13].mxu1 }
 0x108   :  { %v842_v5 = vmul.f32 %v731_v4, %v378_v1  ;;  %v872_v6 = vadd.f32 %v871_v63, %v841_v58 }
 0x109   :  { %v1185_v7 = vpop.f32.mrb[14].mxu0 }
 0x10a   :  { %v873_v8 = vadd.f32 %v872_v6, %v842_v5  ;;  %v1249_v9 = vpop.f32.mrb[14].mxu1  ;;  %v388_v10 = vpop.f32.mrb[15].mxu0 }
 0x10b   :  { %v845_v11 = vmul.f32 %v1249_v9, %v1185_v7  ;;  %v741_v12 = vpop.f32.mrb[15].mxu1 }
 0x10c   :  { %v844_v13 = vmul.f32 %v741_v12, %v388_v10  ;;  %v874_v14 = vadd.f32 %v873_v8, %v843_v2 }
 0x10d   :  { %v1188_v15 = vpop.f32.mrb[16].mxu0 }
 0x10e   :  { %v875_v16 = vadd.f32 %v874_v14, %v844_v13  ;;  %v1252_v17 = vpop.f32.mrb[16].mxu1  ;;  %v398_v18 = vpop.f32.mrb[17].mxu0 }
 0x10f   :  { %v847_v19 = vmul.f32 %v1252_v17, %v1188_v15  ;;  %v751_v20 = vpop.f32.mrb[17].mxu1 }
 0x110   :  { %v846_v21 = vmul.f32 %v751_v20, %v398_v18  ;;  %v876_v22 = vadd.f32 %v875_v16, %v845_v11 }
 0x111   :  { %v1191_v23 = vpop.f32.mrb[18].mxu0 }
 0x112   :  { %v877_v24 = vadd.f32 %v876_v22, %v846_v21  ;;  %v1255_v25 = vpop.f32.mrb[18].mxu1  ;;  %v408_v26 = vpop.f32.mrb[19].mxu0 }
 0x113   :  { %v849_v27 = vmul.f32 %v1255_v25, %v1191_v23  ;;  %v761_v28 = vpop.f32.mrb[19].mxu1  ;;  %v1338_v23 = vmov 1966171168   ;;  %v899_v25 = vld [vmem:[%s1656_s1] sm:$0x3]  ;;  %s1339_s1 = smov [#allocation3]  }
 0x114   :  { %v848_v29 = vmul.f32 %v761_v28, %v408_v26  ;;  %v878_v30 = vadd.f32 %v877_v24, %v847_v19  ;;  %v909_v24 = vunpack.c.l.s4 %v1338_v23  ;;  %s950_s10 = sshll.u32 %s1339_s1, 4  ;;  %s951_s10 = int_to_ptr.vmem [resolvable:$true] %s950_s10 }
 0x115   :  { %v1194_v31 = vpop.f32.mrb[20].mxu0  ;;  %s1312_s12 = scalar_lea.vmem %s951_s10, 16  ;;  %s1316_s13 = scalar_lea.vmem %s951_s10, 32 }
 0x116   :  { %v879_v32 = vadd.f32 %v878_v30, %v848_v29  ;;  %v1258_v33 = vpop.f32.mrb[20].mxu1  ;;  %v418_v34 = vpop.f32.mrb[21].mxu0  ;;  %v910_v28 = vunpack.c.0.s8 %v909_v24  ;;  %p1313_p0 = scmp.ne.s32.totalorder %s951_s10, %s1312_s12  ;;  %p1317_p1 = scmp.lt.s32.totalorder %s951_s10, %s951_s10 }
 0x117   :  { %v851_v35 = vmul.f32 %v1258_v33, %v1194_v31  ;;  %v771_v36 = vpop.f32.mrb[21].mxu1  ;;  %p1318_p2 = scmp.lt.s32.totalorder %s1316_s13, %s1312_s12 }
 0x118   :  { %v850_v37 = vmul.f32 %v771_v36, %v418_v34  ;;  %v880_v38 = vadd.f32 %v879_v32, %v849_v27  ;;  %v913_v31 = vsub.s32 %v910_v28, %v1372_v3 }
 0x119   :  { %v1197_v39 = vpop.f32.mrb[22].mxu0  ;;  %p1319_p3 = por %p1318_p2, %p1317_p1 }
 0x11a   :  { %v881_v40 = vadd.f32 %v880_v38, %v850_v37  ;;  %v1261_v41 = vpop.f32.mrb[22].mxu1  ;;  %v428_v42 = vpop.f32.mrb[23].mxu0 }
 0x11b   :  { %v853_v43 = vmul.f32 %v1261_v41, %v1197_v39  ;;  %v781_v44 = vpop.f32.mrb[23].mxu1  ;;  %p1320_p4 = pnand %p1319_p3, %p1313_p0 }
 0x11c   :  { %v852_v45 = vmul.f32 %v781_v44, %v428_v42  ;;  %v882_v46 = vadd.f32 %v881_v40, %v851_v35  ;;  %v901_v35 = vld [vmem:[#allocation2] sm:$0x1] }
 0x11d   :  { %v1200_v47 = vpop.f32.mrb[24].mxu0 }
 0x11e   :  { %v883_v48 = vadd.f32 %v882_v46, %v852_v45  ;;  %v1264_v49 = vpop.f32.mrb[24].mxu1  ;;  %v438_v50 = vpop.f32.mrb[25].mxu0 }
 0x11f   :  { %v855_v51 = vmul.f32 %v1264_v49, %v1200_v47  ;;  %v791_v52 = vpop.f32.mrb[25].mxu1 }
 0x120   :  { %v854_v53 = vmul.f32 %v791_v52, %v438_v50  ;;  %v884_v54 = vadd.f32 %v883_v48, %v853_v43 }
 0x121   :  { %v1203_v55 = vpop.f32.mrb[26].mxu0 }
 0x122   :  { %v885_v56 = vadd.f32 %v884_v54, %v854_v53  ;;  %v1267_v57 = vpop.f32.mrb[26].mxu1  ;;  %v448_v58 = vpop.f32.mrb[27].mxu0 }
 0x123   :  { %v857_v59 = vmul.f32 %v1267_v57, %v1203_v55  ;;  %v801_v60 = vpop.f32.mrb[27].mxu1 }
 0x124   :  { %v856_v61 = vmul.f32 %v801_v60, %v448_v58  ;;  %v886_v62 = vadd.f32 %v885_v56, %v855_v51 }
 0x125   :  { %v1206_v63 = vpop.f32.mrb[28].mxu0 }
 0x126   :  { %v887_v0 = vadd.f32 %v886_v62, %v856_v61  ;;  %v1270_v1 = vpop.f32.mrb[28].mxu1  ;;  %v458_v2 = vpop.f32.mrb[29].mxu0 }
 0x127   :  { %v859_v4 = vmul.f32 %v1270_v1, %v1206_v63  ;;  %v811_v5 = vpop.f32.mrb[29].mxu1 }
 0x128   :  { %v858_v6 = vmul.f32 %v811_v5, %v458_v2  ;;  %v888_v7 = vadd.f32 %v887_v0, %v857_v59 }
 0x129   :  { %v1209_v8 = vpop.f32.mrb[30].mxu0 }
 0x12a   :  { %v889_v9 = vadd.f32 %v888_v7, %v858_v6  ;;  %v1273_v10 = vpop.f32.mrb[30].mxu1  ;;  %v468_v11 = vpop.f32.mrb[31].mxu0 }
 0x12b   :  { %v861_v12 = vmul.f32 %v1273_v10, %v1209_v8  ;;  %v821_v13 = vpop.f32.mrb[31].mxu1 }
 0x12c   :  { %v860_v14 = vmul.f32 %v821_v13, %v468_v11  ;;  %v890_v15 = vadd.f32 %v889_v9, %v859_v4 }
 0x12e   :  { %v891_v16 = vadd.f32 %v890_v15, %v860_v14 }
 0x130   :  { %v892_v17 = vadd.f32 %v891_v16, %v861_v12 }
 0x132   :  { %v893_v18 = vrot.slane %v892_v17, 4 }
 0x134   :  { %v894_v19 = vadd.f32 %v893_v18, %v892_v17 }
 0x136   :  { %v895_v20 = vrot.slane %v894_v19, 2 }
 0x138   :  { %v896_v21 = vadd.f32 %v895_v20, %v894_v19 }
 0x13a   :  { %v897_v22 = vrot.slane %v896_v21, 1 }
 0x13c   :  { %v898_v26 = vadd.f32 %v897_v22, %v896_v21 }
 0x13e   :  { %v900_v27 = vsub.f32 %v898_v26, %v899_v25 }
 0x140   :  { %v903_v29 = vrot.slane %v900_v27, 7 }
 0x142   :  { %v905_v30 = vmul.f32 %v903_v29, %v899_v25 }
 0x144   :  { %v906_v32 = vmul.f32 %v905_v30, %v903_v29 }
 0x146   :  { %v914_v33 = vrot.slane %v906_v32, %v913_v31 }
 0x148   :  { %v915_v34 = vcombine.high %v914_v33, %v914_v33 }
 0x14a   :  { %v922_v36 = vrot.slane %v915_v34, %v913_v31 }
 0x14c   :  { %v924_v37 = vadd.f32 %v922_v36, %v901_v35 }
 0x14e   :  { %925 = vst [vmem:[#allocation2] sm:$0x1] %v924_v37 }
 0x155   :  { %v929_v38 = vld [vmem:[#allocation2] sm:$0x1] }
 0x156   :  { %v931_v39 = vsel %vm930_vm7, %v929_v38, 0.0 }
 0x157   :  { %932 = vadd.xlane.f32.xlu0 %v931_v39 }
 0x1e4   :  { %v933_v40 = vpop.xlane.xlu0 %932 }
 0x1e5   :  { %v934_v41 = vrot.slane %v933_v40, 4 }
 0x1e7   :  { %v935_v42 = vadd.f32 %v934_v41, %v933_v40 }
 0x1e9   :  { %v936_v43 = vrot.slane %v935_v42, 2 }
 0x1eb   :  { %v937_v44 = vadd.f32 %v936_v43, %v935_v42 }
 0x1ed   :  { %v938_v45 = vrot.slane %v937_v44, 1 }
 0x1ef   :  { %v939_v46 = vadd.f32 %v938_v45, %v937_v44 }
 0x1f1   :  { %1306 = vpush %v939_v46 }
 0x222   :  { %s1307_s11 = spop %1306 }
 0x223   :  { %v941_v3 = vstv %s1307_s11 }
 0x224   :  { %943 = vst.msk [vmem:[#allocation3] sm:$0x1] %vm942_vm10, %v941_v3 }
 0x225   :  { %1323 = shalt.err (!%p1320_p4)
}
 0x226   :  { %s1324_s16 = scalar_lea.hbm %s1659_s4, 16 }
 0x227   :  { %p1325_p5 = scmp.ne.s32.totalorder %s1659_s4, %s1324_s16  ;;  %p1328_p6 = scmp.lt.u32.totalorder %s1324_s16, %s1659_s4 }
 0x229   :  { %p1330_p7 = pnand %p1328_p6, %p1325_p5 }
 0x22b   :  { %1333 = shalt.err (!%p1330_p7)
}
 0x22c   :  { %953 = dma.vmem_to_hbm [thread:$0]  %s951_s10, 16, %s1659_s4, [#allocation4]  }
 0x22d   :  { %1334 = dma.done.wait [#allocation4], 16  }
 0x22e   :  { %1335 = vsyncadd [#allocation4], 4294967280 }
 0x22f   :  { %957 = vsyncpa [#allocation4], 1 }

</bundles_post_ra>
